<compile_context>
chip_gen: v6e
topology: v6e:2x2x1
jax: 0.10.0
libtpu: 0.0.40
codegen_flags: <defaults>
</compile_context>

<pallas_src>
import functools

import jax
import jax.numpy as jnp
from jax.experimental import pallas as pl
from jax.experimental.pallas import tpu as pltpu


_VMEM_LIMIT = 32 * 1024 * 1024   # explicit scoped-VMEM budget, safe on v5e/v6e/v7x
_NEG_INF = -1e30                 # additive mask bias value (representable in bf16)


def _round_up(x, m):
    return (x + m - 1) // m * m


def _compiler_params():
    return pltpu.CompilerParams(dimension_semantics=("parallel",),
                                vmem_limit_bytes=_VMEM_LIMIT)


# ---------------------------------------------------------------------------
# Kernel 1: linear transform + packed per-head attention logits.
# ---------------------------------------------------------------------------
def _transform_kernel(x_ref, w_ref, psrc_ref, pdst_ref,
                      xw_ref, asrc_ref, adst_ref):
    x = x_ref[...].astype(jnp.bfloat16)                        # [TM, Fin]
    w = w_ref[...].astype(jnp.bfloat16)                        # [Fin, H*C]
    xw = jnp.dot(x, w, preferred_element_type=jnp.float32)     # f32 accumulate
    xw_bf = xw.astype(jnp.bfloat16)
    xw_ref[...] = xw_bf
    # alpha[n, h] = sum_c xw[n, h*C + c] * att[h, c] : one packed MXU matmul
    # for all heads (no per-head reductions / reshapes / transposes).
    asrc_ref[...] = jnp.dot(xw_bf, psrc_ref[...].astype(jnp.bfloat16),
                            preferred_element_type=jnp.float32)
    adst_ref[...] = jnp.dot(xw_bf, pdst_ref[...].astype(jnp.bfloat16),
                            preferred_element_type=jnp.float32)


# ---------------------------------------------------------------------------
# Kernel 2: masked softmax over neighbors + aggregation (+ bias / activation).
# ---------------------------------------------------------------------------
def _attn_kernel(adjb_ref, xw_ref, asrcT_ref, adst_ref, bias_ref,
                 out_ref, slab_ref, *, heads, out_ch, concat,
                 apply_relu, apply_log_softmax, neg_slope=0.2):
    adj_bias = adjb_ref[...].astype(jnp.float32)      # [TM, N]  0 / -1e30
    a_dst = adst_ref[...]                             # [TM, H]  f32
    xw = xw_ref[...]                                  # [N, H*C] bf16

    hc = heads * out_ch if concat else out_ch
    if slab_ref.shape[1] > hc:                        # zero the lane-pad region
        slab_ref[...] = jnp.zeros_like(slab_ref)

    for h in range(heads):                            # static unrolled head loop
        # e[i, j] = LeakyReLU(alpha_dst[i] + alpha_src[j]) + mask_bias[i, j]
        raw = a_dst[:, h:h + 1] + asrcT_ref[h:h + 1, :]        # [TM, N]
        e = jnp.where(raw >= 0.0, raw, neg_slope * raw)
        e = e + adj_bias
        m = jnp.max(e, axis=1, keepdims=True)
        p = jnp.exp(e - m)                 # masked entries -> exact 0 (self-loops
        s = jnp.sum(p, axis=1, keepdims=True)          # guarantee finite row max)
        # TODO(synk): GATConv attention dropout (p=0.2) is training-only; eval is identity.
        # Un-normalized aggregation on the MXU (bf16 in / f32 out), then a cheap
        # [TM, C] row rescale through the EUP reciprocal instead of an N^2 divide.
        agg = jnp.dot(p.astype(jnp.bfloat16),
                      xw[:, h * out_ch:(h + 1) * out_ch],
                      preferred_element_type=jnp.float32)
        agg = agg * pl.reciprocal(s, approx=True)
        if concat:
            c0 = h * out_ch
            slab_ref[:, c0:c0 + out_ch] = agg          # write into lane slice
        else:
            if h == 0:
                slab_ref[:, :out_ch] = agg
            else:
                slab_ref[:, :out_ch] += agg

    out = slab_ref[...]
    if (not concat) and heads > 1:
        out = out * (1.0 / float(heads))
    out = out + bias_ref[...]                          # bias is [1, Fout_pad]
    if apply_relu:
        out = jnp.maximum(out, 0.0)
    if apply_log_softmax:
        mm = jnp.max(out, axis=1, keepdims=True)
        z = out - mm
        out = z - jnp.log(jnp.sum(jnp.exp(z), axis=1, keepdims=True))
    out_ref[...] = out.astype(out_ref.dtype)


# ---------------------------------------------------------------------------
# One GATConv layer = transform kernel + attention kernel, both row-tiled.
# ---------------------------------------------------------------------------
def gat_layer(x, w, psrc, pdst, bias, adj_bias, *, heads, out_ch, concat,
              apply_relu, apply_log_softmax, out_dtype, tm):
    n_pad, fin = x.shape
    hc = heads * out_ch
    fout_pad = bias.shape[1]
    grid = (n_pad // tm,)

    xw, a_src, a_dst = pl.pallas_call(
        _transform_kernel,
        out_shape=(jax.ShapeDtypeStruct((n_pad, hc), jnp.bfloat16),
                   jax.ShapeDtypeStruct((n_pad, heads), jnp.float32),
                   jax.ShapeDtypeStruct((n_pad, heads), jnp.float32)),
        grid=grid,
        in_specs=[pl.BlockSpec((tm, fin), lambda i: (i, 0)),
                  pl.BlockSpec(w.shape, lambda i: (0, 0)),
                  pl.BlockSpec(psrc.shape, lambda i: (0, 0)),
                  pl.BlockSpec(pdst.shape, lambda i: (0, 0))],
        out_specs=(pl.BlockSpec((tm, hc), lambda i: (i, 0)),
                   pl.BlockSpec((tm, heads), lambda i: (i, 0)),
                   pl.BlockSpec((tm, heads), lambda i: (i, 0))),
        compiler_params=_compiler_params(),
    )(x, w, psrc, pdst)

    # Single transpose per layer (plain JAX glue) instead of per-head [N,1] XLU
    # transposes inside the kernel.
    a_src_t = a_src.T                                  # [heads, N]

    kernel = functools.partial(_attn_kernel, heads=heads, out_ch=out_ch,
                               concat=concat, apply_relu=apply_relu,
                               apply_log_softmax=apply_log_softmax)
    out = pl.pallas_call(
        kernel,
        out_shape=jax.ShapeDtypeStruct((n_pad, fout_pad), out_dtype),
        grid=grid,
        in_specs=[pl.BlockSpec((tm, n_pad), lambda i: (i, 0)),      # adj row stripe
                  pl.BlockSpec((n_pad, hc), lambda i: (0, 0)),      # xw (resident)
                  pl.BlockSpec((heads, n_pad), lambda i: (0, 0)),   # alpha_src^T
                  pl.BlockSpec((tm, heads), lambda i: (i, 0)),      # alpha_dst tile
                  pl.BlockSpec((1, fout_pad), lambda i: (0, 0))],   # bias
        out_specs=pl.BlockSpec((tm, fout_pad), lambda i: (i, 0)),
        scratch_shapes=[pltpu.VMEM((tm, fout_pad), jnp.float32)],
        compiler_params=_compiler_params(),
    )(adj_bias, xw, a_src_t, a_dst, bias)
    return out


def _glorot(key, shape):
    fan = float(sum(shape))
    limit = (6.0 / fan) ** 0.5
    return jax.random.uniform(key, shape, jnp.float32, -limit, limit)


def _head_projection(att):
    """[H, C] attention vector -> block-diagonal [H*C, H] projection matrix."""
    h, c = att.shape
    eye = jnp.eye(h, dtype=att.dtype)
    return (att[:, :, None] * eye[:, None, :]).reshape(h * c, h)


class GATPallas:
    """Pallas equivalent of the PyTorch GAT module (eval-mode forward)."""

    def __init__(self, dim_in, dim_h, dim_out, heads=8, key=None):
        key = jax.random.PRNGKey(0) if key is None else key
        ks = jax.random.split(key, 6)
        self.dim_h, self.dim_out, self.heads = dim_h, dim_out, heads

        # conv1: GATConv(dim_in, dim_h, heads=heads, concat=True)
        self.w1 = _glorot(ks[0], (dim_in, heads * dim_h))
        att_src1 = _glorot(ks[1], (heads, dim_h))
        att_dst1 = _glorot(ks[2], (heads, dim_h))
        self.psrc1 = _head_projection(att_src1)
        self.pdst1 = _head_projection(att_dst1)
        self.fout1 = heads * dim_h
        self.fout1_pad = _round_up(self.fout1, 128)        # lane-dense layer-1 out
        self.bias1 = jnp.zeros((1, self.fout1_pad), jnp.float32)

        # conv2: GATConv(dim_h*heads, dim_out, heads=1, concat=False)
        w2 = _glorot(ks[3], (heads * dim_h, dim_out))
        self.w2 = jnp.zeros((self.fout1_pad, dim_out), jnp.float32).at[
            :heads * dim_h].set(w2)                         # zero rows for padding
        att_src2 = _glorot(ks[4], (1, dim_out))
        att_dst2 = _glorot(ks[5], (1, dim_out))
        self.psrc2 = _head_projection(att_src2)
        self.pdst2 = _head_projection(att_dst2)
        self.bias2 = jnp.zeros((1, dim_out), jnp.float32)

    def __call__(self, x, edge_index, edge_weight=None):
        n = x.shape[0]
        tm = min(_round_up(n, 8), 128)      # row tile (128 fits v7x 64MiB VMEM)
        n_pad = _round_up(n, tm)
        if n_pad != n:
            x = jnp.pad(x, ((0, n_pad - n), (0, 0)))

        # Additive mask bias: 0 for edge src->dst or self-loop, -1e30 otherwise,
        # in bf16 (halves the biggest HBM->VMEM DMA). Plain JAX glue.
        src, dst = edge_index[0], edge_index[1]
        adj = jnp.zeros((n_pad, n_pad), jnp.float32).at[dst, src].add(1.0)
        adj = adj + jnp.eye(n_pad, dtype=jnp.float32)        # self-loops (all rows)
        adj_bias = jnp.where(adj > 0.0, 0.0, _NEG_INF).astype(jnp.bfloat16)
        # TODO(synk): edge_weight is ignored (reference GAT never passes it to GATConv).

        h = gat_layer(x.astype(jnp.float32), self.w1, self.psrc1, self.pdst1,
                      self.bias1, adj_bias, heads=self.heads, out_ch=self.dim_h,
                      concat=True, apply_relu=True, apply_log_softmax=False,
                      out_dtype=jnp.bfloat16, tm=tm)
        # TODO(synk): F.dropout(p=0.2) between layers is training-only; eval forward is identity.
        out = gat_layer(h, self.w2, self.psrc2, self.pdst2, self.bias2, adj_bias,
                        heads=1, out_ch=self.dim_out, concat=False,
                        apply_relu=False, apply_log_softmax=True,
                        out_dtype=jnp.float32, tm=tm)
        return out[:n]


if __name__ == "__main__":
    key = jax.random.PRNGKey(0)
    kx, kp = jax.random.split(key)

    N, dim_in, dim_h, dim_out, heads = 256, 16, 8, 8, 8
    x = jax.random.normal(kx, (N, dim_in), jnp.float32)

    # Deterministic graph: bidirectional edges to neighbors at offsets 1, 2, 5, 11.
    base = jnp.arange(N)
    edge_list = []
    for shift in (1, 2, 5, 11):
        edge_list.append(jnp.stack([base, (base + shift) % N]))
        edge_list.append(jnp.stack([(base + shift) % N, base]))
    edge_index = jnp.concatenate(edge_list, axis=1)   # [2, 2048]

    model = GATPallas(dim_in, dim_h, dim_out, heads=heads, key=kp)
    out = model(x, edge_index)
    jax.block_until_ready(out)

    assert out.shape == (N, dim_out)
    # log_softmax rows should exponentiate-sum to ~1.
    assert jnp.allclose(jnp.sum(jnp.exp(out), axis=-1), 1.0, atol=1e-3)
    print("KERNEL_OK")
</pallas_src>

<mosaic_0001>
module attributes {stable_mosaic.version = 11 : i64} {
  func.func @_transform_kernel(%arg0: i32, %arg1: memref<128x16xf32, #tpu.memory_space<vmem>>, %arg2: memref<16x64xf32, #tpu.memory_space<vmem>>, %arg3: memref<64x8xf32, #tpu.memory_space<vmem>>, %arg4: memref<64x8xf32, #tpu.memory_space<vmem>>, %arg5: memref<128x64xbf16, #tpu.memory_space<vmem>>, %arg6: memref<128x8xf32, #tpu.memory_space<vmem>>, %arg7: memref<128x8xf32, #tpu.memory_space<vmem>>) attributes {dimension_semantics = [#tpu.dimension_semantics<parallel>], iteration_bounds = array<i64: 2>, scalar_prefetch = 0 : i64, scratch_operands = 0 : i64, tpu.core_type = #tpu.core_type<tc>, window_params = [{transform_indices = @transform_0, window_bounds = array<i64: 128, 16>}, {pipeline_mode = #tpu.pipeline_mode<synchronous>, transform_indices = @transform_1, window_bounds = array<i64: 16, 64>}, {pipeline_mode = #tpu.pipeline_mode<synchronous>, transform_indices = @transform_2, window_bounds = array<i64: 64, 8>}, {pipeline_mode = #tpu.pipeline_mode<synchronous>, transform_indices = @transform_3, window_bounds = array<i64: 64, 8>}, {transform_indices = @transform_4, window_bounds = array<i64: 128, 64>}, {transform_indices = @transform_5, window_bounds = array<i64: 128, 8>}, {transform_indices = @transform_6, window_bounds = array<i64: 128, 8>}]} {
    %c0 = arith.constant 0 : index
    %c0_0 = arith.constant 0 : index
    %0 = vector.load %arg1[%c0, %c0_0] : memref<128x16xf32, #tpu.memory_space<vmem>>, vector<128x16xf32>
    %1 = arith.truncf %0 : vector<128x16xf32> to vector<128x16xbf16>
    %c0_1 = arith.constant 0 : index
    %c0_2 = arith.constant 0 : index
    %2 = vector.load %arg2[%c0_1, %c0_2] : memref<16x64xf32, #tpu.memory_space<vmem>>, vector<16x64xf32>
    %3 = arith.truncf %2 : vector<16x64xf32> to vector<16x64xbf16>
    %cst = arith.constant dense<0.000000e+00> : vector<128x64xf32>
    %4 = tpu.matmul %1, %3, %cst {dimension_numbers = #tpu.dot_dimension_numbers<[1], [0], [0], [1], [0, 0, 1, 1], [], []>} : vector<128x16xbf16>, vector<16x64xbf16>, vector<128x64xf32> -> vector<128x64xf32>
    %5 = arith.truncf %4 : vector<128x64xf32> to vector<128x64xbf16>
    %c0_3 = arith.constant 0 : index
    %c0_4 = arith.constant 0 : index
    %6 = vector.load %arg5[%c0_3, %c0_4] : memref<128x64xbf16, #tpu.memory_space<vmem>>, vector<128x64xbf16>
    tpu.vector_store %arg5[%c0_3, %c0_4], %5 {strides = array<i32>} : memref<128x64xbf16, #tpu.memory_space<vmem>>, vector<128x64xbf16>,
    %c0_5 = arith.constant 0 : index
    %c0_6 = arith.constant 0 : index
    %7 = vector.load %arg3[%c0_5, %c0_6] : memref<64x8xf32, #tpu.memory_space<vmem>>, vector<64x8xf32>
    %8 = arith.truncf %7 : vector<64x8xf32> to vector<64x8xbf16>
    %cst_7 = arith.constant dense<0.000000e+00> : vector<128x8xf32>
    %9 = tpu.matmul %5, %8, %cst_7 {dimension_numbers = #tpu.dot_dimension_numbers<[1], [0], [0], [1], [0, 0, 1, 1], [], []>} : vector<128x64xbf16>, vector<64x8xbf16>, vector<128x8xf32> -> vector<128x8xf32>
    %c0_8 = arith.constant 0 : index
    %c0_9 = arith.constant 0 : index
    %10 = vector.load %arg6[%c0_8, %c0_9] : memref<128x8xf32, #tpu.memory_space<vmem>>, vector<128x8xf32>
    tpu.vector_store %arg6[%c0_8, %c0_9], %9 {strides = array<i32>} : memref<128x8xf32, #tpu.memory_space<vmem>>, vector<128x8xf32>,
    %c0_10 = arith.constant 0 : index
    %c0_11 = arith.constant 0 : index
    %11 = vector.load %arg4[%c0_10, %c0_11] : memref<64x8xf32, #tpu.memory_space<vmem>>, vector<64x8xf32>
    %12 = arith.truncf %11 : vector<64x8xf32> to vector<64x8xbf16>
    %cst_12 = arith.constant dense<0.000000e+00> : vector<128x8xf32>
    %13 = tpu.matmul %5, %12, %cst_12 {dimension_numbers = #tpu.dot_dimension_numbers<[1], [0], [0], [1], [0, 0, 1, 1], [], []>} : vector<128x64xbf16>, vector<64x8xbf16>, vector<128x8xf32> -> vector<128x8xf32>
    %c0_13 = arith.constant 0 : index
    %c0_14 = arith.constant 0 : index
    %14 = vector.load %arg7[%c0_13, %c0_14] : memref<128x8xf32, #tpu.memory_space<vmem>>, vector<128x8xf32>
    tpu.vector_store %arg7[%c0_13, %c0_14], %13 {strides = array<i32>} : memref<128x8xf32, #tpu.memory_space<vmem>>, vector<128x8xf32>,
    return
  }
  func.func @transform_0(%arg0: i32) -> (i32, i32) {
    %c0_i32 = arith.constant 0 : i32
    %c0_i32_0 = arith.constant 0 : i32
    return %arg0, %c0_i32 : i32, i32
  }
  func.func @transform_1(%arg0: i32) -> (i32, i32) {
    %c0_i32 = arith.constant 0 : i32
    %c0_i32_0 = arith.constant 0 : i32
    %c0_i32_1 = arith.constant 0 : i32
    return %c0_i32, %c0_i32_0 : i32, i32
  }
  func.func @transform_2(%arg0: i32) -> (i32, i32) {
    %c0_i32 = arith.constant 0 : i32
    %c0_i32_0 = arith.constant 0 : i32
    %c0_i32_1 = arith.constant 0 : i32
    return %c0_i32, %c0_i32_0 : i32, i32
  }
  func.func @transform_3(%arg0: i32) -> (i32, i32) {
    %c0_i32 = arith.constant 0 : i32
    %c0_i32_0 = arith.constant 0 : i32
    %c0_i32_1 = arith.constant 0 : i32
    return %c0_i32, %c0_i32_0 : i32, i32
  }
  func.func @transform_4(%arg0: i32) -> (i32, i32) {
    %c0_i32 = arith.constant 0 : i32
    %c0_i32_0 = arith.constant 0 : i32
    return %arg0, %c0_i32 : i32, i32
  }
  func.func @transform_5(%arg0: i32) -> (i32, i32) {
    %c0_i32 = arith.constant 0 : i32
    %c0_i32_0 = arith.constant 0 : i32
    return %arg0, %c0_i32 : i32, i32
  }
  func.func @transform_6(%arg0: i32) -> (i32, i32) {
    %c0_i32 = arith.constant 0 : i32
    %c0_i32_0 = arith.constant 0 : i32
    return %arg0, %c0_i32 : i32, i32
  }
}

</mosaic_0001>

<bundles_post_ra>
// kernel: tpu_custom_call.1
= control target key start
LH: loop header
LB: loop body
LE: loop exit
PB: predicated region body
PF: predicated region fallthrough
CT: control target
= control target key end

     0   :  { %s1136_s21 = smov 0   ;;  %s1366_s0 = inlined_call_operand.vmem [shape: f32[256,16], index: 0, kind: input, shape index: {}]   ;;  %s1367_s1 = inlined_call_operand.vmem [shape: f32[16,64], index: 1, kind: input, shape index: {}]   ;;  %s1368_s2 = inlined_call_operand.vmem [shape: f32[64,8], index: 2, kind: input, shape index: {}]   ;;  %s1369_s3 = inlined_call_operand.vmem [shape: f32[64,8], index: 3, kind: input, shape index: {}]   ;;  %s1370_s4 = inlined_call_operand.vmem [shape: bf16[256,64], index: 4, kind: output, shape index: {0}]   ;;  %s1371_s5 = inlined_call_operand.vmem [shape: f32[256,8], index: 5, kind: output, shape index: {1}]   ;;  %s1372_s6 = inlined_call_operand.vmem [shape: f32[256,8], index: 6, kind: output, shape index: {2}]  }
   0x1 LB: > { %s913_s22 = sadd.s32 4294967295, %s1099_s21   ;;  %p917_p0 = scmp.ge.s32.totalorder %s1099_s21, 1  ;;  %s1099_s21 = sphi %s1136_s21, %s17_s21  }
   0x2   : > { %p218_p1 = scmp.lt.s32.totalorder %s1099_s21, 3 }
   0x4   : > { %p219_p2 = pnand %p917_p0, %p218_p1 }
   0x5   : > { %s918_s27 = sshll.u32 (!%p219_p2), %s913_s22, 4 }
   0x6   : > { %222 = sbr.rel (%p219_p2) target bundleno = 444 (0x1bc), region = 36  ;;  %p259_p3 = scmp.lt.s32.totalorder (!%p219_p2), %s918_s27, 31 }
   0xb   : > { %v307_v0 = vld [vmem:[%s1367_s1] sm:$0xff]  ;;  %v308_v1 = vld [vmem:[%s1367_s1 + $0x8] sm:$0xff]  ;;  %v519_v2 = vld [vmem:[%s1368_s2 + $0x30] sm:$0xff]  ;;  %s1374_s27 = smov (!%p259_p3, %s918_s27), 31  ;;  %vm310_vm0 = vcmask 130048   ;;  %vm496_vm1 = vcmask 519168  }
   0xc   : > { %v309_v3 = vpack.c.bf16 %v308_v1, %v307_v0  ;;  %v520_v4 = vld [vmem:[%s1368_s2 + $0x38] sm:$0xff]  ;;  %v670_v5 = vld [vmem:[%s1369_s3 + $0x30] sm:$0xff]  ;;  %s1165_s12 = sshll.u32 %s1374_s27, 3  ;;  %v668_v9 = vld [vmem:[%s1369_s3 + $0x20] sm:$0xff]  ;;  %s921_s19 = sshll.u32 %s1374_s27, 2  ;;  %vm525_vm2 = vcmask 523264  }
   0xd   : > { %v671_v6 = vld [vmem:[%s1369_s3 + $0x38] sm:$0xff]  ;;  %v524_v7 = vpack.c.bf16 %v520_v4, %v519_v2  ;;  %s1171_s15 = scalar_lea.vmem %s1366_s0, %s1165_s12  ;;  %v669_v10 = vld [vmem:[%s1369_s3 + $0x28] sm:$0xff]  ;;  %v517_v21 = vld [vmem:[%s1368_s2 + $0x20] sm:$0xff]  ;;  %s1237_s23 = scalar_lea.vmem %s1370_s4, %s921_s19  ;;  %vm647_vm3 = vcmask 64512  }
   0xe   : > { %v675_v8 = vpack.c.bf16 %v671_v6, %v670_v5  ;;  %1017 = vmatprep.subr.bf16.mxu0 %v309_v3  ;;  %1083 = vmatprep.subr.bf16.mxu1 %v309_v3  ;;  %v283_v11 = vld [vmem:[%s1171_s15] sm:$0xff]  ;;  %v284_v12 = vld [vmem:[%s1171_s15 + $0x8] sm:$0xff]  ;;  %v285_v13 = vld [vmem:[%s1171_s15 + $0x10] sm:$0xff]  ;;  %v674_v23 = vpack.c.bf16 %v669_v10, %v668_v9  ;;  %s1291_s25 = scalar_lea.vmem %s1371_s5, %s1165_s12  ;;  %s1297_s29 = scalar_lea.vmem %s1372_s6, %s1165_s12 }
   0xf   : > { %1018 = vmatpush3.bf16.msra.mxu0 %v309_v3  ;;  %1084 = vmatpush3.bf16.msra.mxu1 %v309_v3  ;;  %v299_v14 = vpack.c.bf16 %v284_v12, %v283_v11  ;;  %v286_v15 = vld [vmem:[%s1171_s15 + $0x18] sm:$0xff]  ;;  %v287_v16 = vld [vmem:[%s1171_s15 + $0x20] sm:$0xff]  ;;  %v288_v17 = vld [vmem:[%s1171_s15 + $0x28] sm:$0xff] }
  0x10   : > { %1035 = vmatprep.subr.bf16.mxu1 %v524_v7  ;;  %1059 = vmatprep.subr.bf16.mxu0 %v675_v8  ;;  %v300_v18 = vpack.c.bf16 %v286_v15, %v285_v13  ;;  %v301_v19 = vpack.c.bf16 %v288_v17, %v287_v16  ;;  %v291_v20 = vld [vmem:[%s1171_s15 + $0x40] sm:$0xff]  ;;  %v518_v22 = vld [vmem:[%s1368_s2 + $0x28] sm:$0xff]  ;;  %v293_v25 = vld [vmem:[%s1171_s15 + $0x50] sm:$0xff] }
  0x11   : > { %1019 = vmatprep.mubr.msk.bf16.mxu0 %vm310_vm0, %v299_v14  ;;  %v292_v24 = vld [vmem:[%s1171_s15 + $0x48] sm:$0xff]  ;;  %v294_v26 = vld [vmem:[%s1171_s15 + $0x58] sm:$0xff]  ;;  %v295_v29 = vld [vmem:[%s1171_s15 + $0x60] sm:$0xff]  ;;  %v523_v34 = vpack.c.bf16 %v518_v22, %v517_v21 }
  0x12   : > { %1020 = vmatmul.mubr.msk.bf16.vlgmr.msra.gmra.mxu0 %vm310_vm0, %v300_v18  ;;  %v303_v27 = vpack.c.bf16 %v292_v24, %v291_v20  ;;  %v304_v28 = vpack.c.bf16 %v294_v26, %v293_v25  ;;  %v296_v30 = vld [vmem:[%s1171_s15 + $0x68] sm:$0xff]  ;;  %v289_v31 = vld [vmem:[%s1171_s15 + $0x30] sm:$0xff]  ;;  %v290_v32 = vld [vmem:[%s1171_s15 + $0x38] sm:$0xff] }
  0x13   : > { %1023 = vmatprep.mubr.msk.bf16.mxu0 %vm310_vm0, %v301_v19  ;;  %v305_v33 = vpack.c.bf16 %v296_v30, %v295_v29  ;;  %1060 = vmatpush3.bf16.msra.mxu0 %v675_v8  ;;  %v302_v35 = vpack.c.bf16 %v290_v32, %v289_v31  ;;  %v297_v36 = vld [vmem:[%s1171_s15 + $0x70] sm:$0xff]  ;;  %v298_v37 = vld [vmem:[%s1171_s15 + $0x78] sm:$0xff]  ;;  %v513_v45 = vld [vmem:[%s1368_s2] sm:$0xff] }
  0x14   : > { %1027 = vmatprep.mubr.msk.bf16.mxu1 %vm310_vm0, %v303_v27  ;;  %1061 = vmatprep.subr.bf16.mxu0 %v674_v23  ;;  %v306_v38 = vpack.c.bf16 %v298_v37, %v297_v36  ;;  %v515_v39 = vld [vmem:[%s1368_s2 + $0x10] sm:$0xff]  ;;  %v516_v40 = vld [vmem:[%s1368_s2 + $0x18] sm:$0xff]  ;;  %v514_v46 = vld [vmem:[%s1368_s2 + $0x8] sm:$0xff] }
  0x15   : > { %1028 = vmatmul.mubr.msk.bf16.vlgmr.msra.gmra.mxu1 %vm310_vm0, %v304_v28  ;;  %v666_v41 = vld [vmem:[%s1369_s3 + $0x10] sm:$0xff]  ;;  %v522_v42 = vpack.c.bf16 %v516_v40, %v515_v39  ;;  %v667_v43 = vld [vmem:[%s1369_s3 + $0x18] sm:$0xff]  ;;  %v664_v47 = vld [vmem:[%s1369_s3] sm:$0xff]  ;;  %v521_v48 = vpack.c.bf16 %v514_v46, %v513_v45 }
  0x16   : > { %1031 = vmatprep.mubr.msk.bf16.mxu1 %vm310_vm0, %v305_v33  ;;  %1036 = vmatpush3.bf16.msra.mxu1 %v524_v7  ;;  %v673_v44 = vpack.c.bf16 %v667_v43, %v666_v41  ;;  %v665_v49 = vld [vmem:[%s1369_s3 + $0x8] sm:$0xff] }
  0x17   : > { %1037 = vmatprep.subr.bf16.mxu1 %v523_v34  ;;  %1062 = vmatpush3.bf16.msra.mxu0 %v674_v23  ;;  %v672_v50 = vpack.c.bf16 %v665_v49, %v664_v47 }
  0x18   : > { %1063 = vmatprep.subr.bf16.mxu0 %v673_v44 }
  0x1a   : > { %1024 = vmatmul.mubr.msk.bf16.gmra.mxu0 %vm310_vm0, %v302_v35  ;;  %1038 = vmatpush3.bf16.msra.mxu1 %v523_v34 }
  0x1b   : > { %1039 = vmatprep.subr.bf16.mxu1 %v522_v42  ;;  %1064 = vmatpush3.bf16.msra.mxu0 %v673_v44 }
  0x1c   : > { %1065 = vmatprep.subr.bf16.mxu0 %v672_v50 }
  0x1d   : > { %1032 = vmatmul.mubr.msk.bf16.gmra.mxu1 %vm310_vm0, %v306_v38 }
  0x1e   : > { %1040 = vmatpush3.bf16.msra.mxu1 %v522_v42 }
  0x1f   : > { %1041 = vmatprep.subr.bf16.mxu1 %v521_v48  ;;  %1066 = vmatpush3.bf16.msra.mxu0 %v672_v50 }
  0x22   : > { %1042 = vmatpush3.bf16.msra.mxu1 %v521_v48 }
  0xd2   : > { %v1021_v51 = vpop.f32.mrf.mxu0 }
  0xd3   : > { %v970_v52 = vpack.c.bf16 %v1021_v51, %v1021_v51 }
  0xd4   : > { %v369_v53 = vpop.f32.mrf.mxu0 }
  0xd5   : > { %499 = vst.msk [vmem:[%s1237_s23 + $0x8] sm:$0xf] %vm496_vm1, %v970_v52  ;;  %v968_v54 = vpack.c.bf16 %v369_v53, %v369_v53  ;;  %v1029_v55 = vpop.f32.mrf.mxu1 }
  0xd6   : > { %v1022_v56 = vpop.f32.mrf.mxu0  ;;  %v978_v57 = vpack.c.bf16 %v1029_v55, %v1029_v55 }
  0xd7   : > { %497 = vst.msk [vmem:[%s1237_s23] sm:$0xf] %vm496_vm1, %v968_v54  ;;  %v971_v58 = vpack.c.bf16 %v1022_v56, %v1022_v56  ;;  %v401_v59 = vpop.f32.mrf.mxu1  ;;  %v433_v1 = vpack.c.bf16 %v1022_v56, %v1021_v51 }
  0xd8   : > { %v372_v60 = vpop.f32.mrf.mxu0  ;;  %507 = vst.msk [vmem:[%s1237_s23 + $0x28] sm:$0xf] %vm496_vm1, %v978_v57  ;;  %v976_v61 = vpack.c.bf16 %v401_v59, %v401_v59 }
  0xd9   : > { %500 = vst.msk [vmem:[%s1237_s23 + $0xc] sm:$0xf] %vm496_vm1, %v971_v58  ;;  %v432_v62 = vpack.c.bf16 %v372_v60, %v369_v53  ;;  %v969_v63 = vpack.c.bf16 %v372_v60, %v372_v60  ;;  %v1030_v0 = vpop.f32.mrf.mxu1 }
  0xda   : > { %v1025_v2 = vpop.f32.mrf.mxu0  ;;  %505 = vst.msk [vmem:[%s1237_s23 + $0x20] sm:$0xf] %vm496_vm1, %v976_v61  ;;  %v979_v3 = vpack.c.bf16 %v1030_v0, %v1030_v0  ;;  %v437_v25 = vpack.c.bf16 %v1030_v0, %v1029_v55 }
  0xdb   : > { %498 = vst.msk [vmem:[%s1237_s23 + $0x4] sm:$0xf] %vm496_vm1, %v969_v63  ;;  %v974_v4 = vpack.c.bf16 %v1025_v2, %v1025_v2  ;;  %1043 = vmatprep.mubr.msk.bf16.mxu1 %vm525_vm2, %v432_v62  ;;  %1067 = vmatprep.mubr.msk.bf16.mxu0 %vm525_vm2, %v432_v62  ;;  %v404_v5 = vpop.f32.mrf.mxu1 }
  0xdc   : > { %v385_v6 = vpop.f32.mrf.mxu0  ;;  %1044 = vmatmul.mubr.msk.bf16.vlgmr.msra.gmra.mxu1 %vm525_vm2, %v433_v1  ;;  %1068 = vmatmul.mubr.msk.bf16.vlgmr.msra.gmra.mxu0 %vm525_vm2, %v433_v1  ;;  %508 = vst.msk [vmem:[%s1237_s23 + $0x2c] sm:$0xf] %vm496_vm1, %v979_v3  ;;  %v977_v7 = vpack.c.bf16 %v404_v5, %v404_v5  ;;  %v436_v18 = vpack.c.bf16 %v404_v5, %v401_v59 }
  0xdd   : > { %503 = vst.msk [vmem:[%s1237_s23 + $0x18] sm:$0xf] %vm496_vm1, %v974_v4  ;;  %v972_v8 = vpack.c.bf16 %v385_v6, %v385_v6  ;;  %v1033_v9 = vpop.f32.mrf.mxu1 }
  0xde   : > { %v1026_v10 = vpop.f32.mrf.mxu0  ;;  %506 = vst.msk [vmem:[%s1237_s23 + $0x24] sm:$0xf] %vm496_vm1, %v977_v7  ;;  %v982_v11 = vpack.c.bf16 %v1033_v9, %v1033_v9 }
  0xdf   : > { %501 = vst.msk [vmem:[%s1237_s23 + $0x10] sm:$0xf] %vm496_vm1, %v972_v8  ;;  %v975_v12 = vpack.c.bf16 %v1026_v10, %v1026_v10  ;;  %v417_v13 = vpop.f32.mrf.mxu1  ;;  %v435_v20 = vpack.c.bf16 %v1026_v10, %v1025_v2 }
  0xe0   : > { %v388_v14 = vpop.f32.mrf.mxu0  ;;  %511 = vst.msk [vmem:[%s1237_s23 + $0x38] sm:$0xf] %vm496_vm1, %v982_v11  ;;  %v980_v15 = vpack.c.bf16 %v417_v13, %v417_v13 }
  0xe1   : > { %504 = vst.msk [vmem:[%s1237_s23 + $0x1c] sm:$0xf] %vm496_vm1, %v975_v12  ;;  %v434_v16 = vpack.c.bf16 %v388_v14, %v385_v6  ;;  %v973_v17 = vpack.c.bf16 %v388_v14, %v388_v14  ;;  %v1034_v19 = vpop.f32.mrf.mxu1 }
  0xe2   : > { %509 = vst.msk [vmem:[%s1237_s23 + $0x30] sm:$0xf] %vm496_vm1, %v980_v15  ;;  %v983_v21 = vpack.c.bf16 %v1034_v19, %v1034_v19  ;;  %v439_v26 = vpack.c.bf16 %v1034_v19, %v1033_v9 }
  0xe3   : > { %502 = vst.msk [vmem:[%s1237_s23 + $0x14] sm:$0xf] %vm496_vm1, %v973_v17  ;;  %1047 = vmatprep.mubr.msk.bf16.mxu1 %vm525_vm2, %v434_v16  ;;  %1071 = vmatprep.mubr.msk.bf16.mxu0 %vm525_vm2, %v434_v16  ;;  %v420_v22 = vpop.f32.mrf.mxu1 }
  0xe4   : > { %1048 = vmatmul.mubr.msk.bf16.gmra.mxu1 %vm525_vm2, %v435_v20  ;;  %1072 = vmatmul.mubr.msk.bf16.gmra.mxu0 %vm525_vm2, %v435_v20  ;;  %512 = vst.msk [vmem:[%s1237_s23 + $0x3c] sm:$0xf] %vm496_vm1, %v983_v21  ;;  %v981_v23 = vpack.c.bf16 %v420_v22, %v420_v22  ;;  %v438_v24 = vpack.c.bf16 %v420_v22, %v417_v13 }
  0xe5   : > { %1051 = vmatprep.mubr.msk.bf16.mxu1 %vm525_vm2, %v436_v18  ;;  %1075 = vmatprep.mubr.msk.bf16.mxu0 %vm525_vm2, %v436_v18 }
  0xe6   : > { %510 = vst.msk [vmem:[%s1237_s23 + $0x34] sm:$0xf] %vm496_vm1, %v981_v23 }
  0xec   : > { %1052 = vmatmul.mubr.msk.bf16.gmra.mxu1 %vm525_vm2, %v437_v25  ;;  %1076 = vmatmul.mubr.msk.bf16.gmra.mxu0 %vm525_vm2, %v437_v25 }
  0xed   : > { %1055 = vmatprep.mubr.msk.bf16.mxu1 %vm525_vm2, %v438_v24  ;;  %1079 = vmatprep.mubr.msk.bf16.mxu0 %vm525_vm2, %v438_v24 }
  0xf4   : > { %1056 = vmatmul.mubr.msk.bf16.gmra.mxu1 %vm525_vm2, %v439_v26  ;;  %1080 = vmatmul.mubr.msk.bf16.gmra.mxu0 %vm525_vm2, %v439_v26 }
 0x19c   : > { %v1045_v27 = vpop.f32.mrf.mxu1  ;;  %v1069_v28 = vpop.f32.mrf.mxu0 }
 0x19d   : > { %650 = vst.msk [vmem:[%s1291_s25 + $0x10] sm:$0xff] %vm647_vm3, %v1045_v27  ;;  %775 = vst.msk [vmem:[%s1297_s29 + $0x10] sm:$0xff] %vm647_vm3, %v1069_v28 }
 0x19e   : > { %v584_v29 = vpop.f32.mrf.mxu1  ;;  %v710_v30 = vpop.f32.mrf.mxu0 }
 0x19f   : > { %648 = vst.msk [vmem:[%s1291_s25] sm:$0xff] %vm647_vm3, %v584_v29  ;;  %773 = vst.msk [vmem:[%s1297_s29] sm:$0xff] %vm647_vm3, %v710_v30 }
 0x1a0   : > { %v1046_v31 = vpop.f32.mrf.mxu1  ;;  %v1070_v32 = vpop.f32.mrf.mxu0 }
 0x1a1   : > { %651 = vst.msk [vmem:[%s1291_s25 + $0x18] sm:$0xff] %vm647_vm3, %v1046_v31  ;;  %776 = vst.msk [vmem:[%s1297_s29 + $0x18] sm:$0xff] %vm647_vm3, %v1070_v32 }
 0x1a2   : > { %v587_v33 = vpop.f32.mrf.mxu1  ;;  %v713_v34 = vpop.f32.mrf.mxu0 }
 0x1a3   : > { %649 = vst.msk [vmem:[%s1291_s25 + $0x8] sm:$0xff] %vm647_vm3, %v587_v33  ;;  %774 = vst.msk [vmem:[%s1297_s29 + $0x8] sm:$0xff] %vm647_vm3, %v713_v34 }
 0x1a4   : > { %v1049_v35 = vpop.f32.mrf.mxu1  ;;  %v1073_v36 = vpop.f32.mrf.mxu0 }
 0x1a5   : > { %654 = vst.msk [vmem:[%s1291_s25 + $0x30] sm:$0xff] %vm647_vm3, %v1049_v35  ;;  %779 = vst.msk [vmem:[%s1297_s29 + $0x30] sm:$0xff] %vm647_vm3, %v1073_v36 }
 0x1a6   : > { %v600_v37 = vpop.f32.mrf.mxu1  ;;  %v726_v38 = vpop.f32.mrf.mxu0 }
 0x1a7   : > { %652 = vst.msk [vmem:[%s1291_s25 + $0x20] sm:$0xff] %vm647_vm3, %v600_v37  ;;  %777 = vst.msk [vmem:[%s1297_s29 + $0x20] sm:$0xff] %vm647_vm3, %v726_v38 }
 0x1a8   : > { %v1050_v39 = vpop.f32.mrf.mxu1  ;;  %v1074_v40 = vpop.f32.mrf.mxu0 }
 0x1a9   : > { %655 = vst.msk [vmem:[%s1291_s25 + $0x38] sm:$0xff] %vm647_vm3, %v1050_v39  ;;  %780 = vst.msk [vmem:[%s1297_s29 + $0x38] sm:$0xff] %vm647_vm3, %v1074_v40 }
 0x1aa   : > { %v603_v41 = vpop.f32.mrf.mxu1  ;;  %v729_v42 = vpop.f32.mrf.mxu0 }
 0x1ab   : > { %653 = vst.msk [vmem:[%s1291_s25 + $0x28] sm:$0xff] %vm647_vm3, %v603_v41  ;;  %778 = vst.msk [vmem:[%s1297_s29 + $0x28] sm:$0xff] %vm647_vm3, %v729_v42 }
 0x1ac   : > { %v1053_v43 = vpop.f32.mrf.mxu1  ;;  %v1077_v44 = vpop.f32.mrf.mxu0 }
 0x1ad   : > { %658 = vst.msk [vmem:[%s1291_s25 + $0x50] sm:$0xff] %vm647_vm3, %v1053_v43  ;;  %783 = vst.msk [vmem:[%s1297_s29 + $0x50] sm:$0xff] %vm647_vm3, %v1077_v44 }
 0x1ae   : > { %v616_v45 = vpop.f32.mrf.mxu1  ;;  %v742_v46 = vpop.f32.mrf.mxu0 }
 0x1af   : > { %656 = vst.msk [vmem:[%s1291_s25 + $0x40] sm:$0xff] %vm647_vm3, %v616_v45  ;;  %781 = vst.msk [vmem:[%s1297_s29 + $0x40] sm:$0xff] %vm647_vm3, %v742_v46 }
 0x1b0   : > { %v1054_v47 = vpop.f32.mrf.mxu1  ;;  %v1078_v48 = vpop.f32.mrf.mxu0 }
 0x1b1   : > { %659 = vst.msk [vmem:[%s1291_s25 + $0x58] sm:$0xff] %vm647_vm3, %v1054_v47  ;;  %784 = vst.msk [vmem:[%s1297_s29 + $0x58] sm:$0xff] %vm647_vm3, %v1078_v48 }
 0x1b2   : > { %v619_v49 = vpop.f32.mrf.mxu1  ;;  %v745_v50 = vpop.f32.mrf.mxu0 }
 0x1b3   : > { %657 = vst.msk [vmem:[%s1291_s25 + $0x48] sm:$0xff] %vm647_vm3, %v619_v49  ;;  %782 = vst.msk [vmem:[%s1297_s29 + $0x48] sm:$0xff] %vm647_vm3, %v745_v50 }
 0x1b4   : > { %v1057_v51 = vpop.f32.mrf.mxu1  ;;  %v1081_v52 = vpop.f32.mrf.mxu0 }
 0x1b5   : > { %662 = vst.msk [vmem:[%s1291_s25 + $0x70] sm:$0xff] %vm647_vm3, %v1057_v51  ;;  %787 = vst.msk [vmem:[%s1297_s29 + $0x70] sm:$0xff] %vm647_vm3, %v1081_v52 }
 0x1b6   : > { %v632_v53 = vpop.f32.mrf.mxu1  ;;  %v758_v54 = vpop.f32.mrf.mxu0 }
 0x1b7   : > { %660 = vst.msk [vmem:[%s1291_s25 + $0x60] sm:$0xff] %vm647_vm3, %v632_v53  ;;  %785 = vst.msk [vmem:[%s1297_s29 + $0x60] sm:$0xff] %vm647_vm3, %v758_v54 }
 0x1b8   : > { %v1058_v55 = vpop.f32.mrf.mxu1  ;;  %v1082_v56 = vpop.f32.mrf.mxu0 }
 0x1b9   : > { %663 = vst.msk [vmem:[%s1291_s25 + $0x78] sm:$0xff] %vm647_vm3, %v1058_v55  ;;  %788 = vst.msk [vmem:[%s1297_s29 + $0x78] sm:$0xff] %vm647_vm3, %v1082_v56 }
 0x1ba   : > { %v635_v57 = vpop.f32.mrf.mxu1  ;;  %v761_v58 = vpop.f32.mrf.mxu0 }
 0x1bb   : > { %661 = vst.msk [vmem:[%s1291_s25 + $0x68] sm:$0xff] %vm647_vm3, %v635_v57  ;;  %786 = vst.msk [vmem:[%s1297_s29 + $0x68] sm:$0xff] %vm647_vm3, %v761_v58 }
 0x1bc PF: > { %s17_s21 = sadd.s32 1, %s1099_s21  }
 0x1bd   : > { %p14_p4 = scmp.ge.s32.totalorder %s17_s21, 4  }
 0x1bf   :  { %16 = sbr.rel (!%p14_p4) target bundleno = 1 (0x1), region = 90 }

</bundles_post_ra>
